<compile_context>
chip_gen: v7x
topology: tpu7x:2x2x1
jax: 0.10.0
libtpu: 0.0.40
codegen_flags: <defaults>
</compile_context>

<pallas_src>
import functools
import math

import jax
import jax.numpy as jnp
from jax import lax
from jax.experimental import pallas as pl
from jax.experimental.pallas import tpu as pltpu


def _attn_core_kernel(x_ref, wqkv_ref, bqkv_ref, ctxT_ref, *, n_rows, q_tile):
    """One batch element: fused QKV projection + softmax attention -> ctx^T (C, N), bf16."""
    x = x_ref[0]                                                          # (N, C) f32
    C = x.shape[-1]

    # Fused QKV projection: bf16 operands, f32 accumulation.  Q is pre-scaled in the wrapper.
    qkv = jnp.dot(x.astype(jnp.bfloat16), wqkv_ref[...],
                  preferred_element_type=jnp.float32) + bqkv_ref[...]     # (N, 3C) f32
    # Slice + cast immediately; do not keep the f32 (N, 3C) slab live through softmax.
    q = qkv[:, :C].astype(jnp.bfloat16)
    k = qkv[:, C:2 * C].astype(jnp.bfloat16)
    v = qkv[:, 2 * C:].astype(jnp.bfloat16)

    # Query-row tiling: score temporaries are (tq, N) instead of (N, N); K/V computed once.
    for start in range(0, n_rows, q_tile):
        end = min(n_rows, start + q_tile)
        q_t = q[start:end, :]                                             # (tq, C) bf16

        # Scores: contract last dims of Q and K (no explicit transpose materialized).
        # (Per review: if the bundle dump ever shows a per-step vxpose of K here, produce K in a
        #  contraction-friendly layout; hidden under MXU slack for C >= 256.)
        s = lax.dot_general(q_t, k, (((1,), (1,)), ((), ())),
                            preferred_element_type=jnp.float32)           # (tq, N) f32

        # Softmax in f32; denominator reciprocal on the EUP.
        s = s - jnp.max(s, axis=-1, keepdims=True)
        e = jnp.exp(s)
        p = (e * pl.reciprocal(jnp.sum(e, axis=-1, keepdims=True),
                               approx=True)).astype(jnp.bfloat16)         # (tq, N) bf16

        # ctx^T tile straight off the MXU: ctx^T[c, i] = sum_m V[m, c] * P[i, m]  -> (C, tq).
        # This fuses the module's transpose(1, 2) into the matmul (no separate XLU/XLA pass).
        ctx_t = lax.dot_general(v, p, (((0,), (1,)), ((), ())),
                                preferred_element_type=jnp.float32)       # (C, tq) f32
        ctxT_ref[0, :, start:end] = ctx_t.astype(ctxT_ref.dtype)


def _proj_kernel(y_ref, w_ref, b_ref, o_ref):
    """Row-tiled output projection on the flattened (B*N, C) bf16 slab."""
    o_ref[...] = (jnp.dot(y_ref[...], w_ref[...], preferred_element_type=jnp.float32)
                  + b_ref[...]).astype(o_ref.dtype)


def _vmem_budget_bytes():
    """Generation-aware VMEM budget: physical capacity minus headroom for compiler scratch."""
    try:
        cap = int(pltpu.get_tpu_info().vmem_capacity_bytes)
    except Exception:
        cap = 64 << 20                       # conservative fallback (v7x-sized)
    return max(cap - (16 << 20), 16 << 20)   # v7x: ~48 MiB, v5e/v6e: ~112 MiB


def _clamp_vmem(est_bytes, budget):
    return int(min(max(est_bytes + (4 << 20), 16 << 20), budget))


def attention2_forward(x, params, *, num_heads=8, q_tile=512, proj_rows=512):
    """x: (B, N, C) float32.  params: dict of f32 weights laid out (in, out)."""
    B, N, C = x.shape
    head_dim = C // num_heads
    scale = 1.0 / math.sqrt(head_dim)

    # ---- fused / pre-scaled weights (cheap one-time XLA ops) ----
    # Folding the scale into Wq/bq before the bf16 cast changes rounding slightly vs. the
    # reference's post-matmul divide; covered by the test tolerance.
    wqkv = jnp.concatenate([params["wq"] * scale, params["wk"], params["wv"]],
                           axis=1).astype(jnp.bfloat16)                   # (C, 3C) bf16
    bqkv = jnp.concatenate([params["bq"] * scale, params["bk"], params["bv"]],
                           axis=1).astype(jnp.float32)                    # (1, 3C) f32
    wp = params["wp"].astype(jnp.bfloat16)                                # (C, C) bf16
    bp = params["bp"].astype(jnp.float32)                                 # (1, C) f32

    budget = _vmem_budget_bytes()
    tq = min(N, q_tile)

    # ---- kernel 1: fused QKV + attention core + fused transpose, grid over batch ----
    io1 = 2 * (N * C * 4) + 2 * (C * 3 * C * 2) + 2 * (3 * C * 4) + 2 * (C * N * 2)
    work1 = N * 3 * C * 4 + 3 * N * C * 2 + 3 * tq * N * 4 + C * tq * 4
    ctx_t = pl.pallas_call(
        functools.partial(_attn_core_kernel, n_rows=N, q_tile=tq),
        out_shape=jax.ShapeDtypeStruct((B, C, N), jnp.bfloat16),          # ctx^T, bf16 intermediate
        grid_spec=pltpu.PrefetchScalarGridSpec(
            num_scalar_prefetch=0,
            grid=(B,),
            in_specs=[
                pl.BlockSpec((1, N, C), lambda b: (b, 0, 0)),     # x
                pl.BlockSpec((C, 3 * C), lambda b: (0, 0)),       # fused Wqkv (bf16, grid-invariant)
                pl.BlockSpec((1, 3 * C), lambda b: (0, 0)),       # fused bqkv (f32, grid-invariant)
            ],
            out_specs=pl.BlockSpec((1, C, N), lambda b: (b, 0, 0)),
        ),
        compiler_params=pltpu.CompilerParams(
            dimension_semantics=("parallel",),
            vmem_limit_bytes=_clamp_vmem(io1 + work1, budget),
        ),
    )(x, wqkv, bqkv)

    # Module's `.transpose(1, 2).reshape(B, N, C)`: ctx_t already holds the (B, C, N) layout,
    # so flattening to (B*N, C) is a free contiguous reshape (no HBM transpose pass).
    y = ctx_t.reshape(B * N, C)

    # ---- kernel 2: output projection on the flattened (B*N, C) bf16 slab ----
    M = B * N
    tm = min(M, proj_rows)
    io2 = 2 * (tm * C * 2) + 2 * (C * C * 2) + 2 * (C * 4) + 2 * (tm * C * 4)
    out = pl.pallas_call(
        _proj_kernel,
        out_shape=jax.ShapeDtypeStruct((M, C), x.dtype),
        grid_spec=pltpu.PrefetchScalarGridSpec(
            num_scalar_prefetch=0,
            grid=(pl.cdiv(M, tm),),
            in_specs=[
                pl.BlockSpec((tm, C), lambda i: (i, 0)),          # y rows (bf16)
                pl.BlockSpec((C, C), lambda i: (0, 0)),           # Wp (bf16, grid-invariant)
                pl.BlockSpec((1, C), lambda i: (0, 0)),           # bp (f32, grid-invariant)
            ],
            out_specs=pl.BlockSpec((tm, C), lambda i: (i, 0)),
        ),
        compiler_params=pltpu.CompilerParams(
            dimension_semantics=("parallel",),
            vmem_limit_bytes=_clamp_vmem(io2 + tm * C * 4, budget),
        ),
    )(y, wp, bp)

    return out.reshape(B, N, C)


def init_params(key, dim):
    """Mimics nn.Linear default init: U(-1/sqrt(fan_in), 1/sqrt(fan_in)) for W and b."""
    keys = jax.random.split(key, 8)

    def linear(kw, kb, fan_in, fan_out):
        bound = 1.0 / math.sqrt(fan_in)
        w = jax.random.uniform(kw, (fan_in, fan_out), jnp.float32, -bound, bound)
        b = jax.random.uniform(kb, (1, fan_out), jnp.float32, -bound, bound)
        return w, b

    wq, bq = linear(keys[0], keys[1], dim, dim)
    wk, bk = linear(keys[2], keys[3], dim, dim)
    wv, bv = linear(keys[4], keys[5], dim, dim)
    wp, bp = linear(keys[6], keys[7], dim, dim)
    return dict(wq=wq, bq=bq, wk=wk, bk=bk, wv=wv, bv=bv, wp=wp, bp=bp)


def attention2_reference(x, p, *, num_heads=8):
    """Pure-JAX f32 reference mirroring the PyTorch forward (eval mode, dead qkv line omitted)."""
    B, N, C = x.shape
    head_dim = C // num_heads
    q = x @ p["wq"] + p["bq"]
    k = x @ p["wk"] + p["bk"]
    v = x @ p["wv"] + p["bv"]
    s = jnp.einsum("bnc,bmc->bnm", q, k) / math.sqrt(head_dim)
    probs = jax.nn.softmax(s, axis=-1)
    ctx = jnp.einsum("bnm,bmc->bnc", probs, v)
    y = jnp.swapaxes(ctx, 1, 2).reshape(B, N, C)   # torch .transpose(1, 2).reshape(B, N, C)
    return y @ p["wp"] + p["bp"]


if __name__ == "__main__":
    B, N, C, num_heads = 2, 8, 32, 8
    key = jax.random.PRNGKey(0)
    kx, kp = jax.random.split(key)

    x = jax.random.normal(kx, (B, N, C), jnp.float32)
    params = init_params(kp, C)

    out = jax.block_until_ready(attention2_forward(x, params, num_heads=num_heads))
    ref = jax.block_until_ready(attention2_reference(x, params, num_heads=num_heads))

    assert out.shape == (B, N, C)
    err = float(jnp.max(jnp.abs(out - ref)))
    # bf16 MXU operands + bf16 ctx intermediate with f32 accumulation vs. pure-f32 reference.
    assert jnp.allclose(out, ref, atol=6e-2, rtol=6e-2), err
    print("KERNEL_OK")
</pallas_src>

<mosaic_0001>
module attributes {stable_mosaic.version = 11 : i64} {
  func.func @_attn_core_kernel(%arg0: i32, %arg1: memref<1x8x32xf32, #tpu.memory_space<vmem>>, %arg2: memref<32x96xbf16, #tpu.memory_space<vmem>>, %arg3: memref<1x96xf32, #tpu.memory_space<vmem>>, %arg4: memref<1x32x8xbf16, #tpu.memory_space<vmem>>) attributes {dimension_semantics = [#tpu.dimension_semantics<parallel>], iteration_bounds = array<i64: 2>, scalar_prefetch = 0 : i64, scratch_operands = 0 : i64, tpu.core_type = #tpu.core_type<tc>, window_params = [{transform_indices = @transform_0, window_bounds = array<i64: 1, 8, 32>}, {pipeline_mode = #tpu.pipeline_mode<synchronous>, transform_indices = @transform_1, window_bounds = array<i64: 32, 96>}, {pipeline_mode = #tpu.pipeline_mode<synchronous>, transform_indices = @transform_2, window_bounds = array<i64: 1, 96>}, {transform_indices = @transform_3, window_bounds = array<i64: 1, 32, 8>}]} {
    %c0 = arith.constant 0 : index
    %c0_0 = arith.constant 0 : index
    %c0_1 = arith.constant 0 : index
    %0 = vector.load %arg1[%c0, %c0_0, %c0_1] : memref<1x8x32xf32, #tpu.memory_space<vmem>>, vector<1x8x32xf32>
    %1 = vector.shape_cast %0 : vector<1x8x32xf32> to vector<8x32xf32>
    %2 = arith.truncf %1 : vector<8x32xf32> to vector<8x32xbf16>
    %c0_2 = arith.constant 0 : index
    %c0_3 = arith.constant 0 : index
    %3 = vector.load %arg2[%c0_2, %c0_3] : memref<32x96xbf16, #tpu.memory_space<vmem>>, vector<32x96xbf16>
    %cst = arith.constant dense<0.000000e+00> : vector<8x96xf32>
    %4 = tpu.matmul %2, %3, %cst {dimension_numbers = #tpu.dot_dimension_numbers<[1], [0], [0], [1], [0, 0, 1, 1], [], []>} : vector<8x32xbf16>, vector<32x96xbf16>, vector<8x96xf32> -> vector<8x96xf32>
    %c0_4 = arith.constant 0 : index
    %c0_5 = arith.constant 0 : index
    %5 = vector.load %arg3[%c0_4, %c0_5] : memref<1x96xf32, #tpu.memory_space<vmem>>, vector<1x96xf32>
    %6 = vector.broadcast %5 : vector<1x96xf32> to vector<8x96xf32>
    %7 = arith.addf %4, %6 : vector<8x96xf32>
    %8 = vector.extract_strided_slice %7 {offsets = [0, 0], sizes = [8, 32], strides = [1, 1]} : vector<8x96xf32> to vector<8x32xf32>
    %9 = arith.truncf %8 : vector<8x32xf32> to vector<8x32xbf16>
    %10 = vector.extract_strided_slice %7 {offsets = [0, 32], sizes = [8, 32], strides = [1, 1]} : vector<8x96xf32> to vector<8x32xf32>
    %11 = arith.truncf %10 : vector<8x32xf32> to vector<8x32xbf16>
    %12 = vector.extract_strided_slice %7 {offsets = [0, 64], sizes = [8, 32], strides = [1, 1]} : vector<8x96xf32> to vector<8x32xf32>
    %13 = arith.truncf %12 : vector<8x32xf32> to vector<8x32xbf16>
    %cst_6 = arith.constant dense<0.000000e+00> : vector<8x8xf32>
    %14 = tpu.matmul %9, %11, %cst_6 {dimension_numbers = #tpu.dot_dimension_numbers<[1], [1], [0], [0], [0, 0, 1, 0], [], []>} : vector<8x32xbf16>, vector<8x32xbf16>, vector<8x8xf32> -> vector<8x8xf32>
    %cst_7 = arith.constant dense<0xFF800000> : vector<8xf32>
    %15 = vector.multi_reduction <maximumf>, %14, %cst_7 [1] : vector<8x8xf32> to vector<8xf32>
    %16 = vector.shape_cast %15 : vector<8xf32> to vector<8x1xf32>
    %17 = vector.broadcast %16 : vector<8x1xf32> to vector<8x8xf32>
    %18 = arith.subf %14, %17 : vector<8x8xf32>
    %19 = math.exp %18 : vector<8x8xf32>
    %cst_8 = arith.constant dense<0.000000e+00> : vector<8xf32>
    %20 = vector.multi_reduction <add>, %19, %cst_8 [1] : vector<8x8xf32> to vector<8xf32>
    %21 = vector.shape_cast %20 : vector<8xf32> to vector<8x1xf32>
    %22 = tpu.reciprocal %21 {approx = true} : vector<8x1xf32> -> vector<8x1xf32>
    %23 = vector.broadcast %22 : vector<8x1xf32> to vector<8x8xf32>
    %24 = arith.mulf %19, %23 : vector<8x8xf32>
    %25 = arith.truncf %24 : vector<8x8xf32> to vector<8x8xbf16>
    %cst_9 = arith.constant dense<0.000000e+00> : vector<32x8xf32>
    %26 = tpu.matmul %13, %25, %cst_9 {dimension_numbers = #tpu.dot_dimension_numbers<[0], [1], [1], [0], [0, 1, 1, 0], [], []>} : vector<8x32xbf16>, vector<8x8xbf16>, vector<32x8xf32> -> vector<32x8xf32>
    %27 = arith.truncf %26 : vector<32x8xf32> to vector<32x8xbf16>
    %c0_10 = arith.constant 0 : index
    %c0_11 = arith.constant 0 : index
    %c0_12 = arith.constant 0 : index
    %28 = vector.load %arg4[%c0_10, %c0_11, %c0_12] : memref<1x32x8xbf16, #tpu.memory_space<vmem>>, vector<1x32x8xbf16>
    %29 = vector.shape_cast %28 : vector<1x32x8xbf16> to vector<32x8xbf16>
    %30 = vector.shape_cast %27 : vector<32x8xbf16> to vector<1x32x8xbf16>
    tpu.vector_store %arg4[%c0_10, %c0_11, %c0_12], %30 {strides = array<i32>} : memref<1x32x8xbf16, #tpu.memory_space<vmem>>, vector<1x32x8xbf16>,
    return
  }
  func.func @transform_0(%arg0: i32) -> (i32, i32, i32) {
    %c0_i32 = arith.constant 0 : i32
    %c0_i32_0 = arith.constant 0 : i32
    %c0_i32_1 = arith.constant 0 : i32
    return %arg0, %c0_i32, %c0_i32_0 : i32, i32, i32
  }
  func.func @transform_1(%arg0: i32) -> (i32, i32) {
    %c0_i32 = arith.constant 0 : i32
    %c0_i32_0 = arith.constant 0 : i32
    %c0_i32_1 = arith.constant 0 : i32
    return %c0_i32, %c0_i32_0 : i32, i32
  }
  func.func @transform_2(%arg0: i32) -> (i32, i32) {
    %c0_i32 = arith.constant 0 : i32
    %c0_i32_0 = arith.constant 0 : i32
    %c0_i32_1 = arith.constant 0 : i32
    return %c0_i32, %c0_i32_0 : i32, i32
  }
  func.func @transform_3(%arg0: i32) -> (i32, i32, i32) {
    %c0_i32 = arith.constant 0 : i32
    %c0_i32_0 = arith.constant 0 : i32
    %c0_i32_1 = arith.constant 0 : i32
    return %arg0, %c0_i32, %c0_i32_0 : i32, i32, i32
  }
}

</mosaic_0001>

<bundles_post_ra>
// kernel: tpu_custom_call.1
= control target key start
LH: loop header
LB: loop body
LE: loop exit
PB: predicated region body
PF: predicated region fallthrough
CT: control target
= control target key end

     0   :  { %8 = vsyncpa [#allocation3], 0  ;;  %s909_s0 = inlined_call_operand.hbm [shape: f32[2,8,32], index: 0, kind: input, shape index: {}]   ;;  %s910_s1 = inlined_call_operand.hbm [shape: bf16[32,96], index: 1, kind: input, shape index: {}]   ;;  %s911_s2 = inlined_call_operand.vmem [shape: f32[1,96], index: 2, kind: input, shape index: {}]   ;;  %s912_s3 = inlined_call_operand.vmem [shape: bf16[2,32,8], index: 3, kind: output, shape index: {}]  }
   0x1   :  { %10 = vsyncpa [#allocation3 + $0x1], 0 }
   0x2   :  { %11 = vsyncpa [#allocation5], 0  ;;  %s758_s12 = smov 0   ;;  %s760_s13 = smov 0  }
   0x3   :  { %s762_s14 = smov 0   ;;  %s764_s15 = smov 0  }
   0x4 LB: > { %s777_s16 = sadd.s32 4294967295, %s728_s15   ;;  %p37_p0 = scmp.ne.s32.totalorder %s720_s13, %s716_s12  ;;  %s728_s15 = sphi %s764_s15, %s927_s15   ;;  %s724_s14 = sphi %s762_s14, %s926_s14   ;;  %s720_s13 = sphi %s760_s13, %s925_s13   ;;  %s716_s12 = sphi %s758_s12, %s924_s12  }
   0x5   : > { %p913_p1 = scmp.eq.s32.totalorder %s777_s16, 0  ;;  %p512_p2 = scmp.ge.s32.totalorder %s728_s15, 1 }
   0x6   : > { %p116_p3 = scmp.lt.s32.totalorder %s728_s15, 3  ;;  %s730_s19 = smov [#allocation4]  }
   0x7   : > { %p785_p4 = por %p913_p1, %p37_p0  ;;  %s128_s20 = sshll.u32 %s730_s19, 4  ;;  %s129_s20 = int_to_ptr.vmem [resolvable:$true] %s128_s20 }
   0x8   : > { %p789_p5 = pnand %p512_p2, %p116_p3  ;;  %s802_s22 = sadd.s32 1, %s728_s15  }
   0x9   : > { %s916_s17 = scalar_select %p785_p4, 1, 0 }
   0xa   : > { %s917_s18 = scalar_select %p789_p5, 1, 0 }
   0xb   : > { %p575_p6 = pneg %p789_p5  ;;  %s24_s23 = sadd.s32 1, %s724_s14 }
   0xc   : > { %s21_s24 = ssub.s32 %s728_s15, %s802_s22  ;;  %s632_s27 = scalar_lea.hbm %s910_s1, 256 }
   0xd   : > { %p797_p7 = pnand %p575_p6, %p913_p1  ;;  %p633_p8 = scmp.ne.s32.totalorder %s910_s1, %s632_s27 }
   0xe   : > { %p639_p12 = scmp.lt.u32.totalorder %s632_s27, %s910_s1 }
   0xf   : > { %p634_p9 = pneg %p797_p7 }
  0x11   : > { %p635_p10 = pnand %p634_p9, %p633_p8 }
  0x13   : > { %p636_p11 = pneg %p635_p10 }
  0x15   : > { %p641_p13 = pnand %p639_p12, %p636_p11 }
  0x17   : > { %644 = shalt.err (!%p641_p13)
}
  0x18   : > { %s645_s5 = scalar_lea.vmem %s129_s20, 256  ;;  %p653_p6 = scmp.lt.s32.totalorder %s129_s20, %s129_s20 }
  0x19   : > { %p646_p0 = scmp.ne.s32.totalorder %s129_s20, %s645_s5  ;;  %p654_p1 = scmp.lt.s32.totalorder %s645_s5, %s645_s5 }
  0x1b   : > { %p648_p2 = pnand %p646_p0, %p634_p9  ;;  %p655_p4 = por %p654_p1, %p653_p6 }
  0x1d   : > { %p649_p3 = pneg %p648_p2 }
  0x1f   : > { %p656_p5 = pnand %p655_p4, %p649_p3 }
  0x21   : > { %659 = shalt.err (!%p656_p5)
}
  0x22   : > { %s731_s6 = smov 64   ;;  %s732_s7 = smov 4  }
  0x23   : > { %578 = dma.hbm_to_vmem [thread:$0]  (!%p797_p7), %s910_s1, 256, %s129_s20, [#allocation5], %s731_s6, %s731_s6, %s732_s7  }
  0x24   : > { %p22_p8 = scmp.eq.s32.totalorder %s21_s24, 0  ;;  %p31_p9 = scmp.ne.s32.totalorder %s724_s14, %s720_s13 }
  0x25   : > { %p32_p1 = scmp.eq.s32.totalorder %s728_s15, 0  ;;  %p584_p4 = scmp.lt.s32.totalorder %s728_s15, 2 }
  0x26   : > { %s828_s10 = scalar_select %p22_p8, %s724_s14, %s24_s23  }
  0x27   : > { %p33_p5 = por %p32_p1, %p31_p9  ;;  %s145_s11 = sand.u32 1, %s724_s14  }
  0x28   : > { %s515_s12 = sshll.u32 %s145_s11, 3  ;;  %s516_s19 = sshll.u32 %s728_s15, 7 }
  0x29   : > { %s835_s27 = scalar_lea.hbm %s909_s0, %s516_s19  ;;  %s149_s20 = scalar_lea.vmem [#allocation2], %s515_s12 }
  0x2a   : > { %s156_s21 = sshll.u32 %s149_s20, 4  ;;  %p839_p7 = pnand %p584_p4, %p33_p5  ;;  %s837_s21 = int_to_ptr.vmem [resolvable:$true] %s156_s21 }
  0x2b   : > { %s146_s15 = scalar_lea.sflag [#allocation3], %s145_s11  ;;  %s660_s24 = scalar_lea.hbm %s835_s27, 128 }
  0x2c   : > { %p661_p10 = scmp.ne.s32.totalorder %s835_s27, %s660_s24  ;;  %p662_p11 = pneg %p839_p7 }
  0x2d   : > { %s665_s30 = scalar_lea.hbm %s909_s0, 256  ;;  %p666_p0 = scmp.lt.u32.totalorder %s835_s27, %s909_s0 }
  0x2e   : > { %p663_p12 = pnand %p662_p11, %p661_p10  ;;  %p667_p2 = scmp.lt.u32.totalorder %s665_s30, %s660_s24 }
  0x2f   : > { %p669_p6 = scmp.lt.u32.totalorder %s660_s24, %s835_s27 }
  0x30   : > { %p664_p13 = pneg %p663_p12  ;;  %p668_p3 = por %p667_p2, %p666_p0 }
  0x32   : > { %p670_p8 = por %p669_p6, %p668_p3 }
  0x34   : > { %p671_p9 = pnand %p670_p8, %p664_p13 }
  0x36   : > { %674 = shalt.err (!%p671_p9)
}
  0x37   : > { %s675_s6 = scalar_lea.vmem %s837_s21, 128  ;;  %s733_s7 = smov [#allocation2]  }
  0x38   : > { %p676_p1 = scmp.ne.s32.totalorder %s837_s21, %s675_s6  ;;  %s680_s8 = sshll.u32 %s733_s7, 4  ;;  %s681_s8 = int_to_ptr.vmem [resolvable:$false] %s680_s8 }
  0x39   : > { %s682_s9 = scalar_lea.vmem %s681_s8, 256  ;;  %p683_p10 = scmp.lt.s32.totalorder %s837_s21, %s681_s8 }
  0x3a   : > { %p678_p4 = pnand %p676_p1, %p662_p11  ;;  %p684_p12 = scmp.lt.s32.totalorder %s682_s9, %s675_s6 }
  0x3c   : > { %p679_p5 = pneg %p678_p4  ;;  %p685_p0 = por %p684_p12, %p683_p10 }
  0x3e   : > { %p686_p2 = pnand %p685_p0, %p679_p5 }
  0x40   : > { %689 = shalt.err (!%p686_p2)
}
  0x41   : > { %582 = dma.hbm_to_vmem [thread:$0]  (!%p839_p7), %s835_s27, 128, %s837_s21, %s146_s15  }
  0x42   : > { %p920_p13 = scmp.ne.s32.totalorder %s917_s18, 0 }
  0x43   : > { %s167_s11 = sand.u32 (!%p920_p13), 1, %s720_s13   ;;  %p921_p11 = scmp.ne.s32.totalorder (!%p920_p13), %s916_s17, 0 }
  0x44   : > { %165 = sbr.rel (%p920_p13) target bundleno = 1182 (0x49e), region = 32  ;;  %s518_s12 = sshll.u32 (!%p920_p13), %s167_s11, 3 }
  0x45   : > { %s168_s19 = scalar_lea.sflag (!%p920_p13), [#allocation3], %s167_s11  ;;  %s171_s25 = scalar_lea.vmem (!%p920_p13), [#allocation2], %s518_s12 }
  0x4b   : > { %707 = dma.done.wait (%p921_p11), %s168_s19, 128  }
  0x4c   : > { %709 = vsyncadd (%p921_p11), %s168_s19, 4294967168  ;;  %p922_p3 = scmp.eq.s32.totalorder %s777_s16, 0 }
  0x4e   : > { %711 = dma.done.wait (%p922_p3), [#allocation5], 256   ;;  %p923_p6 = pmov %p922_p3 }
  0x4f   : > { %v734_v0 = vmov 0.0   ;;  %vm735_vm0 = vmmov 0   ;;  %v626_v1 = vld [vmem:[#allocation4] sm:$0xff]   ;;  %v627_v2 = vld [vmem:[#allocation4 + $0x8] sm:$0xff]   ;;  %v204_v3 = vld [vmem:[%s171_s25] sm:$0xff]  ;;  %vm229_vm1 = vcmask 261120  }
  0x50   : > { %713 = vsyncadd (%p923_p6), [#allocation5], 4294967040  ;;  %548 = vmatprep.subr.bf16.mxu0 %v734_v0  ;;  %552 = vmatprep.mubr.msk.bf16.mxu0 %vm735_vm0, %v734_v0  ;;  %v205_v4 = vpack.c.bf16 %v204_v3, %v204_v3  ;;  %v522_v5 = vld [vmem:[%s911_s2] ss:$0 sm:$0xff]  ;;  %s736_s26 = smov 64   ;;  %s737_s27 = smov 96  }
  0x51   : > { %556 = vmatprep.subr.bf16.mxu1 %v734_v0  ;;  %558 = vmatprep.mubr.msk.bf16.mxu1 %vm735_vm0, %v734_v0  ;;  %vm323_vm2 = vcmask 64512   ;;  %p198_p7 = scmp.lt.s32.totalorder %s777_s16, 1  ;;  %vm429_vm3 = vcmask 60416  }
  0x52   : > { %549 = vmatpush3.bf16.msra.mxu0 %v626_v1 }
  0x53   : > { %550 = vmatprep.subr.bf16.mxu0 %v734_v0  ;;  %s929_s16 = smov (!%p198_p7, %s777_s16), 1 }
  0x54   : > { %s535_s20 = sshll.u32 %s929_s16, 4 }
  0x55   : > { %s202_s15 = scalar_lea.vmem %s912_s3, %s535_s20 }
  0x56   : > { %551 = vmatpush3.bf16.msra.mxu0 %v627_v2 }
  0x59   : > { %553 = vmatmul.mubr.msk.bf16.vlgmr.msra.gmra.mrb[0].mxu0 %vm229_vm1, %v205_v4 }
 0x12c   : > { %v267_v6 = vpop.f32.mrb[0].mxu0 }
 0x12d   : > { %v268_v7 = vadd.f32 %v522_v5, %v267_v6  ;;  %v554_v8 = vpop.f32.mrb[1].mxu0 }
 0x12e   : > { %v270_v9 = vpop.f32.mrb[2].mxu0 }
 0x12f   : > { %v273_v10 = vpack.c.bf16 %v268_v7, %v268_v7  ;;  %v555_v11 = vpop.f32.mrb[3].mxu0 }
 0x131   : > { %336 = vrot.lane.b32.xlu1 %v273_v10, %s736_s26  ;;  %275 = vrot.lane.b32.xlu0 %v273_v10, %s737_s27 }
 0x1a3   : > { %v276_v12 = vpop.permute.xlu0 %275  ;;  %v337_v19 = vpop.permute.xlu1 %336 }
 0x1a4   : > { %v281_v13 = vsel %vm229_vm1, %v276_v12, 0 }
 0x1a5   : > { %557 = vmatpush3.bf16.xpose.msra.mxu1 %v281_v13 }
 0x1ac   : > { %559 = vmatmul.mubr.msk.bf16.vlgmr.msra.gmra.mrb[0].mxu1 %vm229_vm1, %v273_v10 }
 0x27f   : > { %v317_v14 = vpop.f32.mrb[0].mxu1 }
 0x280   : > { %v560_v15 = vpop.f32.mrb[1].mxu1  ;;  %v324_v16 = vsel %vm323_vm2, %v317_v14, -inf }
 0x281   : > { %325 = vmax.xlane.f32.xlu0 %v324_v16  ;;  %v320_v17 = vpop.f32.mrb[2].mxu1 }
 0x282   : > { %v561_v18 = vpop.f32.mrb[3].mxu1 }
 0x2ae   : > { %339 = vxpose.xlu0.c.b16.start.end [1/1] (short) (narrow) %v337_v19, 32 }
 0x30e   : > { %v326_v20 = vpop.xlane.xlu0 %325 }
 0x30f   : > { %v327_v21 = vsub.f32 %v317_v14, %v326_v20 }
 0x311   : > { %v328_v22 = vmul.f32 1.442695, %v327_v21 }
 0x313   : > { %628 = vpow2.f32 %v328_v22 }
 0x314   : > { %v347_v25 = vpop.trf.xlu0 }
 0x315   : > { %564 = vmatprep.mubr.msk.bf16.mxu0 %vm323_vm2, %v347_v25 }
 0x318   : > { %v348_v31 = vpop.trf.xlu0 }
 0x31d   : > { %v629_v23 = vpop.eup %628 }
 0x31e   : > { %v330_v24 = vsel %vm323_vm2, %v629_v23, 0.0 }
 0x31f   : > { %331 = vadd.xlane.f32.xlu1 %v330_v24 }
 0x3ac   : > { %v332_v26 = vpop.xlane.xlu1 %331 }
 0x3ad   : > { %630 = vrcp.f32 %v332_v26 }
 0x3b7   : > { %v631_v27 = vpop.eup %630 }
 0x3b8   : > { %v334_v28 = vmul.f32 %v631_v27, %v629_v23 }
 0x3ba   : > { %v335_v29 = vpack.c.bf16 %v334_v28, %v334_v28 }
 0x3bc   : > { %568 = vmatprep.subr.msk.bf16.mxu0 %vm323_vm2, %v335_v29  ;;  %v362_v30 = vsel %vm323_vm2, %v335_v29, 0 }
 0x3bd   : > { %563 = vmatpush3.bf16.xpose.msra.mxu0 %v362_v30 }
 0x3c4   : > { %565 = vmatmul.mubr.msk.bf16.vlgmr.msra.gmra.mrb[4].mxu0 %vm323_vm2, %v348_v31 }
 0x497   : > { %v566_v32 = vpop.f32.mrb[4].mxu0 }
 0x498   : > { %v538_v33 = vpack.c.bf16 %v566_v32, %v566_v32  ;;  %v398_v34 = vpop.f32.mrb[5].mxu0 }
 0x499   : > { %v536_v35 = vpack.c.bf16 %v398_v34, %v398_v34  ;;  %v567_v36 = vpop.f32.mrb[6].mxu0 }
 0x49a   : > { %432 = vst.msk [vmem:[%s202_s15 + $0x8] sm:$0xf] %vm429_vm3, %v538_v33  ;;  %v539_v37 = vpack.c.bf16 %v567_v36, %v567_v36  ;;  %v401_v38 = vpop.f32.mrb[7].mxu0 }
 0x49b   : > { %430 = vst.msk [vmem:[%s202_s15] sm:$0xf] %vm429_vm3, %v536_v35  ;;  %v537_v39 = vpack.c.bf16 %v401_v38, %v401_v38 }
 0x49c   : > { %433 = vst.msk [vmem:[%s202_s15 + $0xc] sm:$0xf] %vm429_vm3, %v539_v37 }
 0x49d   : > { %431 = vst.msk [vmem:[%s202_s15 + $0x4] sm:$0xf] %vm429_vm3, %v537_v39 }
 0x49e PF: > { %p14_p8 = scmp.ge.s32.totalorder %s802_s22, 4   ;;  %s924_s12 = smov %s720_s13 }
 0x49f   : > { %s925_s13 = smov %s724_s14  ;;  %s926_s14 = smov %s828_s10 }
 0x4a0   : > { %s927_s15 = smov %s802_s22  ;;  %16 = sbr.rel (!%p14_p8) target bundleno = 4 (0x4), region = 76 }
 0x4a7   :  { %455 = vsyncpa [#allocation3], 1 }
 0x4a8   :  { %457 = vsyncpa [#allocation3 + $0x1], 1 }
 0x4a9   :  { %458 = vsyncpa [#allocation5], 1 }

</bundles_post_ra>
